<compile_context>
chip_gen: v5e
topology: v5e:2x2
jax: 0.10.0
libtpu: 0.0.40
codegen_flags: <defaults>
</compile_context>

<pallas_src>
import jax
import jax.numpy as jnp
from jax.experimental import pallas as pl
from jax.experimental.pallas import tpu as pltpu

_LANE = 128
_BLOCK_BYTES_TARGET = 4 * 1024 * 1024  # ~4 MiB per buffer: safe on v5e/v6e/v7x


def _scalar_gate_kernel(g_ref, x_ref, o_ref):
    # g_ref: (1,) f32 scalar in SMEM (scalar-prefetched).
    # x_ref / o_ref: (tile_rows, 128) tiles in VMEM.
    g = g_ref[0]                                    # single scalar read per step
    x = x_ref[...].astype(jnp.float32)              # compute in f32 (torch promotion)
    o_ref[...] = (g * x).astype(o_ref.dtype)


def _round_up(n: int, m: int) -> int:
    return ((n + m - 1) // m) * m


def scalar_gate(x: jax.Array, gate) -> jax.Array:
    """Computes gate * x elementwise. `gate` is a scalar (f32) parameter."""
    orig_shape = x.shape
    total = x.size

    in_dtype = jnp.dtype(x.dtype)
    # PyTorch: float32 Parameter * x  -> promoted dtype (f32 for f32/bf16 x).
    out_dtype = jnp.promote_types(jnp.float32, in_dtype)

    # --- build a lane-dense 2D slab with zero extra HBM passes when possible ---
    if total % _LANE == 0:
        rows = total // _LANE
        x2d = x.reshape(rows, _LANE)                # contiguous reshape: free
        needs_unpad = False
    else:
        # Rare fallback for element counts not divisible by 128.
        padded = _round_up(total, _LANE)
        x2d = jnp.pad(x.reshape(-1), (0, padded - total)).reshape(padded // _LANE, _LANE)
        rows = padded // _LANE
        needs_unpad = True

    # --- tile sizing: big blocks, multiple of 8 sublanes, ragged grid via cdiv ---
    in_isz = in_dtype.itemsize
    out_isz = jnp.dtype(out_dtype).itemsize
    max_isz = max(in_isz, out_isz)
    tile_rows_target = max(8, (_BLOCK_BYTES_TARGET // (_LANE * max_isz)) // 8 * 8)
    tile_rows = min(tile_rows_target, _round_up(rows, 8))
    grid = (pl.cdiv(rows, tile_rows),)

    # Double-buffered input + output blocks plus headroom.
    block_in_bytes = tile_rows * _LANE * in_isz
    block_out_bytes = tile_rows * _LANE * out_isz
    vmem_limit_bytes = int(2 * (block_in_bytes + block_out_bytes) + (4 << 20))

    g = jnp.asarray(gate, dtype=jnp.float32).reshape(1)

    cost = pl.CostEstimate(
        flops=total,
        transcendentals=0,
        bytes_accessed=total * in_isz + total * out_isz + 4,
    )

    out2d = pl.pallas_call(
        _scalar_gate_kernel,
        out_shape=jax.ShapeDtypeStruct((rows, _LANE), out_dtype),
        grid_spec=pltpu.PrefetchScalarGridSpec(
            num_scalar_prefetch=1,  # gate scalar lives in SMEM for the whole grid
            grid=grid,
            in_specs=[
                pl.BlockSpec((tile_rows, _LANE), lambda i, g: (i, 0)),
            ],
            out_specs=pl.BlockSpec((tile_rows, _LANE), lambda i, g: (i, 0)),
        ),
        compiler_params=pltpu.CompilerParams(
            dimension_semantics=("parallel",),
            vmem_limit_bytes=vmem_limit_bytes,
        ),
        cost_estimate=cost,
    )(g, x2d)

    if needs_unpad:
        return out2d.reshape(-1)[:total].reshape(orig_shape)
    return out2d.reshape(orig_shape)


if __name__ == "__main__":
    key = jax.random.PRNGKey(0)

    # Deterministic parameter init, matching nn.Parameter(torch.tensor(init)).
    # TODO(synk): module default init=0.0 would make the output all zeros; use a
    # non-zero value so the test exercises a non-trivial multiply.
    gate = jnp.float32(0.5)

    # Small NCHW input consistent with a conv-style feature map.
    x = jax.random.normal(key, (2, 4, 16, 16), dtype=jnp.float32)

    out = scalar_gate(x, gate)
    out = jax.block_until_ready(out)

    # Reference check against plain JAX.
    ref = gate * x
    assert out.shape == x.shape
    assert out.dtype == ref.dtype
    assert jnp.allclose(out, ref, atol=1e-6), "mismatch vs reference"

    print("KERNEL_OK")
</pallas_src>

<mosaic_0001>
module attributes {stable_mosaic.version = 11 : i64} {
  func.func @_scalar_gate_kernel(%arg0: i32, %arg1: memref<1xf32, #tpu.memory_space<smem>>, %arg2: memref<16x128xf32, #tpu.memory_space<vmem>>, %arg3: memref<16x128xf32, #tpu.memory_space<vmem>>) attributes {dimension_semantics = [#tpu.dimension_semantics<parallel>], iteration_bounds = array<i64: 1>, scalar_prefetch = 1 : i64, scratch_operands = 0 : i64, tpu.core_type = #tpu.core_type<tc>, window_params = [{transform_indices = @transform_0, window_bounds = array<i64: 16, 128>}, {transform_indices = @transform_1, window_bounds = array<i64: 16, 128>}]} {
    %c0 = arith.constant 0 : index
    %0 = memref.load %arg1[%c0] : memref<1xf32, #tpu.memory_space<smem>>
    %c0_0 = arith.constant 0 : index
    %c0_1 = arith.constant 0 : index
    %1 = vector.load %arg2[%c0_0, %c0_1] : memref<16x128xf32, #tpu.memory_space<vmem>>, vector<16x128xf32>
    %2 = vector.broadcast %0 : f32 to vector<16x128xf32>
    %3 = arith.mulf %2, %1 : vector<16x128xf32>
    %c0_2 = arith.constant 0 : index
    %c0_3 = arith.constant 0 : index
    %4 = vector.load %arg3[%c0_2, %c0_3] : memref<16x128xf32, #tpu.memory_space<vmem>>, vector<16x128xf32>
    tpu.vector_store %arg3[%c0_2, %c0_3], %3 {strides = array<i32>} : memref<16x128xf32, #tpu.memory_space<vmem>>, vector<16x128xf32>,
    return
  }
  func.func @transform_0(%arg0: i32, %arg1: memref<1xf32, #tpu.memory_space<smem>>) -> (i32, i32) {
    %c0_i32 = arith.constant 0 : i32
    %c0_i32_0 = arith.constant 0 : i32
    return %arg0, %c0_i32 : i32, i32
  }
  func.func @transform_1(%arg0: i32, %arg1: memref<1xf32, #tpu.memory_space<smem>>) -> (i32, i32) {
    %c0_i32 = arith.constant 0 : i32
    %c0_i32_0 = arith.constant 0 : i32
    return %arg0, %c0_i32 : i32, i32
  }
}

</mosaic_0001>

<bundles_post_ra>
// kernel: tpu_custom_call.1
= control target key start
LH: loop header
LB: loop body
LE: loop exit
PB: predicated region body
PF: predicated region fallthrough
CT: control target
= control target key end

     0   :  { %8 = vsyncpa [#allocation5], 0  ;;  %s138_s0 = inlined_call_operand.<no memory space> [shape: f32[1], index: 0, kind: input, shape index: {}]   ;;  %s139_s1 = inlined_call_operand.hbm [shape: f32[16,128], index: 1, kind: input, shape index: {}]   ;;  %s140_s2 = inlined_call_operand.hbm [shape: f32[16,128], index: 2, kind: output, shape index: {}]  }
   0x1   :  { %9 = vsyncpa [#allocation6], 0  ;;  %s14_s11 = sshll.u32 %s139_s1, 4  ;;  %s110_s12 = smov [#allocation4]   ;;  %s15_s11 = int_to_ptr.hbm [resolvable:$true] %s14_s11 }
   0x2   :  { %s16_s13 = sshll.u32 %s110_s12, 4  ;;  %s111_s14 = smov 128   ;;  %s17_s13 = int_to_ptr.vmem [resolvable:$true] %s16_s13 }
   0x3   :  { %s112_s15 = smov 8  }
   0x4   :  { %22 = dma.hbm_to_vmem [thread:$0]  %s15_s11, 256, %s17_s13, [#allocation5], %s111_s14, %s111_s14, %s112_s15  }
   0x5   :  { %106 = dma.done.wait [#allocation5], 256  }
   0x6   :  { %107 = vsyncadd [#allocation5], 4294967040  ;;  %v30_v0 = vstv %s138_s0  ;;  %s113_s18 = smov [#allocation7]   ;;  %s41_s22 = sshll.u32 %s140_s2, 4  ;;  %v28_v1 = vld [vmem:[#allocation4] sm:$0xff]  ;;  %v29_v2 = vld [vmem:[#allocation4 + $0x8] sm:$0xff]  ;;  %s42_s22 = int_to_ptr.hbm [resolvable:$true] %s41_s22 }
   0x7   :  { %s39_s19 = sshll.u32 %s113_s18, 4  ;;  %v31_v3 = vmul.f32 %v30_v0, %v28_v1  ;;  %v32_v4 = vmul.f32 %v30_v0, %v29_v2  ;;  %s40_s19 = int_to_ptr.vmem [resolvable:$true] %s39_s19 }
   0x9   :  { %33 = vst [vmem:[#allocation7] sm:$0xff] %v31_v3 }
   0xa   :  { %34 = vst [vmem:[#allocation7 + $0x8] sm:$0xff] %v32_v4 }
   0xb   :  { %47 = dma.vmem_to_hbm [thread:$0]  %s40_s19, 256, %s42_s22, [#allocation6], %s111_s14, %s111_s14, %s112_s15  }
   0xc   :  { %108 = dma.done.wait [#allocation6], 256  }
   0xd   :  { %109 = vsyncadd [#allocation6], 4294967040 }
   0xe   :  { %52 = vsyncpa [#allocation5], 1 }
   0xf   :  { %53 = vsyncpa [#allocation6], 1 }

</bundles_post_ra>
